<compile_context>
chip_gen: v7x
topology: tpu7x:2x2x1
jax: 0.10.0
libtpu: 0.0.40
codegen_flags: <defaults>
</compile_context>

<pallas_src>
import math

import jax
import jax.numpy as jnp
from jax.experimental import pallas as pl
from jax.experimental.pallas import tpu as pltpu


# Max lanes per grid step: x block 3*65536*4 = 768 KiB, out block 8*65536*4 = 2 MiB,
# ~5.6 MiB double-buffered -> comfortably under the default scoped VMEM limit on
# every generation (v5e 16 MiB, v6e/v7x 32 MiB).
_MAX_TILE_M = 65536


def _round_up(x, n):
    return ((x + n - 1) // n) * n


def _linear_sub_relu_kernel(x_ref, w_ref, b_ref, o_ref):
    # x_ref: (C_in, tile_m)   feature-major activation tile
    # w_ref: (C_out, C_in)    full weight (tiny, stays resident)
    # b_ref: (C_out, 1)       bias - other (folded on host)
    # o_ref: (C_out, tile_m)  lane-dense output tile
    x = x_ref[...]
    w = w_ref[...]
    y = b_ref[...]                                   # (C_out, 1), broadcasts over lanes
    c_in = x_ref.shape[0]
    # K=3 contraction as unrolled VPU multiply-adds; free filler under the DMA.
    for c in range(c_in):
        y = y + w[:, c:c + 1] * x[c:c + 1, :]        # (C_out,1)*(1,tile_m) -> (C_out,tile_m)
    o_ref[...] = jnp.maximum(y, 0.0).astype(o_ref.dtype)


def model_forward(x, weight, bias, other, *, tile_m=None):
    """x: (..., C_in); weight: (C_out, C_in); bias: (C_out,); other: scalar.
    Returns relu(x @ weight.T + bias - other) with shape (..., C_out), dtype of x."""
    c_in = x.shape[-1]
    c_out = weight.shape[0]
    lead = x.shape[:-1]
    m = math.prod(lead)
    out_dtype = x.dtype

    # Feature-major (lane-dense) layout: rows land on the 128-lane axis.
    x_t = x.reshape(m, c_in).T                                   # (C_in, M)
    b_fold = (bias.astype(jnp.float32)
              - jnp.asarray(other, jnp.float32)).reshape(c_out, 1)
    w = weight.astype(jnp.float32)                               # (C_out, C_in)

    if tile_m is None:
        if m <= _MAX_TILE_M:
            # Whole problem in one grid step: no per-step overhead to amortize,
            # no pointless split on single-TC v5e/v6e.
            tile_m = _round_up(max(m, 1), 128)
        else:
            # Large M: biggest tile that fits VMEM; the "parallel" axis lets
            # v7x shard full-size steps across its two TensorCores.
            tile_m = _MAX_TILE_M

    num_tiles = pl.cdiv(m, tile_m)                               # tail tile handled by Pallas

    out_t = pl.pallas_call(
        _linear_sub_relu_kernel,
        out_shape=jax.ShapeDtypeStruct((c_out, m), out_dtype),
        grid_spec=pl.GridSpec(
            grid=(num_tiles,),
            in_specs=[
                pl.BlockSpec((c_in, tile_m), lambda i: (0, i)),  # x tile (feature-major)
                pl.BlockSpec((c_out, c_in), lambda i: (0, 0)),   # weight (full, resident)
                pl.BlockSpec((c_out, 1), lambda i: (0, 0)),      # bias - other (full, resident)
            ],
            out_specs=pl.BlockSpec((c_out, tile_m), lambda i: (0, i)),
        ),
        compiler_params=pltpu.CompilerParams(
            dimension_semantics=("parallel",)),
    )(x_t, w, b_fold)

    return out_t.T.reshape(*lead, c_out)


if __name__ == "__main__":
    key = jax.random.PRNGKey(0)
    kx, kw, kb = jax.random.split(key, 3)

    B, H, W, C_IN, C_OUT = 2, 16, 16, 3, 8
    x = jax.random.normal(kx, (B, H, W, C_IN), dtype=jnp.float32)

    # Deterministic parameter init with the declared Linear(3, 8) shapes.
    weight = jax.random.normal(kw, (C_OUT, C_IN), dtype=jnp.float32) * 0.5
    bias = jax.random.normal(kb, (C_OUT,), dtype=jnp.float32) * 0.1
    other = 1.0

    out = jax.block_until_ready(model_forward(x, weight, bias, other))

    # Reference check in plain JAX.
    ref = jnp.maximum(
        jnp.einsum("bhwc,oc->bhwo", x, weight) + bias - other, 0.0)
    assert out.shape == (B, H, W, C_OUT)
    assert out.dtype == x.dtype
    assert jnp.allclose(out, ref, atol=1e-5), "mismatch vs reference"

    print("KERNEL_OK")
</pallas_src>

<mosaic_0001>
module attributes {stable_mosaic.version = 11 : i64} {
  func.func @_linear_sub_relu_kernel(%arg0: i32, %arg1: memref<3x512xf32, #tpu.memory_space<vmem>>, %arg2: memref<8x3xf32, #tpu.memory_space<vmem>>, %arg3: memref<8x1xf32, #tpu.memory_space<vmem>>, %arg4: memref<8x512xf32, #tpu.memory_space<vmem>>) attributes {dimension_semantics = [#tpu.dimension_semantics<parallel>], iteration_bounds = array<i64: 1>, scalar_prefetch = 0 : i64, scratch_operands = 0 : i64, tpu.core_type = #tpu.core_type<tc>, window_params = [{transform_indices = @transform_0, window_bounds = array<i64: 3, 512>}, {pipeline_mode = #tpu.pipeline_mode<synchronous>, transform_indices = @transform_1, window_bounds = array<i64: 8, 3>}, {pipeline_mode = #tpu.pipeline_mode<synchronous>, transform_indices = @transform_2, window_bounds = array<i64: 8, 1>}, {transform_indices = @transform_3, window_bounds = array<i64: 8, 512>}]} {
    %c0 = arith.constant 0 : index
    %c0_0 = arith.constant 0 : index
    %0 = vector.load %arg1[%c0, %c0_0] : memref<3x512xf32, #tpu.memory_space<vmem>>, vector<3x512xf32>
    %c0_1 = arith.constant 0 : index
    %c0_2 = arith.constant 0 : index
    %1 = vector.load %arg2[%c0_1, %c0_2] : memref<8x3xf32, #tpu.memory_space<vmem>>, vector<8x3xf32>
    %c0_3 = arith.constant 0 : index
    %c0_4 = arith.constant 0 : index
    %2 = vector.load %arg3[%c0_3, %c0_4] : memref<8x1xf32, #tpu.memory_space<vmem>>, vector<8x1xf32>
    %3 = vector.extract_strided_slice %1 {offsets = [0, 0], sizes = [8, 1], strides = [1, 1]} : vector<8x3xf32> to vector<8x1xf32>
    %4 = vector.extract_strided_slice %0 {offsets = [0, 0], sizes = [1, 512], strides = [1, 1]} : vector<3x512xf32> to vector<1x512xf32>
    %5 = vector.broadcast %3 : vector<8x1xf32> to vector<8x512xf32>
    %6 = vector.broadcast %4 : vector<1x512xf32> to vector<8x512xf32>
    %7 = arith.mulf %5, %6 : vector<8x512xf32>
    %8 = vector.broadcast %2 : vector<8x1xf32> to vector<8x512xf32>
    %9 = arith.addf %8, %7 : vector<8x512xf32>
    %10 = vector.extract_strided_slice %1 {offsets = [0, 1], sizes = [8, 1], strides = [1, 1]} : vector<8x3xf32> to vector<8x1xf32>
    %11 = vector.extract_strided_slice %0 {offsets = [1, 0], sizes = [1, 512], strides = [1, 1]} : vector<3x512xf32> to vector<1x512xf32>
    %12 = vector.broadcast %10 : vector<8x1xf32> to vector<8x512xf32>
    %13 = vector.broadcast %11 : vector<1x512xf32> to vector<8x512xf32>
    %14 = arith.mulf %12, %13 : vector<8x512xf32>
    %15 = arith.addf %9, %14 : vector<8x512xf32>
    %16 = vector.extract_strided_slice %1 {offsets = [0, 2], sizes = [8, 1], strides = [1, 1]} : vector<8x3xf32> to vector<8x1xf32>
    %17 = vector.extract_strided_slice %0 {offsets = [2, 0], sizes = [1, 512], strides = [1, 1]} : vector<3x512xf32> to vector<1x512xf32>
    %18 = vector.broadcast %16 : vector<8x1xf32> to vector<8x512xf32>
    %19 = vector.broadcast %17 : vector<1x512xf32> to vector<8x512xf32>
    %20 = arith.mulf %18, %19 : vector<8x512xf32>
    %21 = arith.addf %15, %20 : vector<8x512xf32>
    %cst = arith.constant 0.000000e+00 : f32
    %22 = vector.broadcast %cst : f32 to vector<8x512xf32>
    %23 = arith.maximumf %21, %22 : vector<8x512xf32>
    %c0_5 = arith.constant 0 : index
    %c0_6 = arith.constant 0 : index
    %24 = vector.load %arg4[%c0_5, %c0_6] : memref<8x512xf32, #tpu.memory_space<vmem>>, vector<8x512xf32>
    tpu.vector_store %arg4[%c0_5, %c0_6], %23 {strides = array<i32>} : memref<8x512xf32, #tpu.memory_space<vmem>>, vector<8x512xf32>,
    return
  }
  func.func @transform_0(%arg0: i32) -> (i32, i32) {
    %c0_i32 = arith.constant 0 : i32
    %c0_i32_0 = arith.constant 0 : i32
    return %c0_i32, %arg0 : i32, i32
  }
  func.func @transform_1(%arg0: i32) -> (i32, i32) {
    %c0_i32 = arith.constant 0 : i32
    %c0_i32_0 = arith.constant 0 : i32
    %c0_i32_1 = arith.constant 0 : i32
    return %c0_i32, %c0_i32_0 : i32, i32
  }
  func.func @transform_2(%arg0: i32) -> (i32, i32) {
    %c0_i32 = arith.constant 0 : i32
    %c0_i32_0 = arith.constant 0 : i32
    %c0_i32_1 = arith.constant 0 : i32
    return %c0_i32, %c0_i32_0 : i32, i32
  }
  func.func @transform_3(%arg0: i32) -> (i32, i32) {
    %c0_i32 = arith.constant 0 : i32
    %c0_i32_0 = arith.constant 0 : i32
    return %c0_i32, %arg0 : i32, i32
  }
}

</mosaic_0001>

<bundles_post_ra>
// kernel: tpu_custom_call.1
= control target key start
LH: loop header
LB: loop body
LE: loop exit
PB: predicated region body
PF: predicated region fallthrough
CT: control target
= control target key end

     0   :  { %v225_v1 = vmov 0   ;;  %v226_v2 = vmov 1   ;;  %s273_s0 = inlined_call_operand.vmem [shape: f32[3,512], index: 0, kind: input, shape index: {}]   ;;  %s274_s1 = inlined_call_operand.vmem [shape: f32[8,3], index: 1, kind: input, shape index: {}]   ;;  %s275_s2 = inlined_call_operand.vmem [shape: f32[8,1], index: 2, kind: input, shape index: {}]   ;;  %s276_s3 = inlined_call_operand.hbm [shape: f32[8,512], index: 3, kind: output, shape index: {}]  }
   0x1   :  { %v17_v0 = vld [vmem:[%s274_s1] sm:$0xff]  ;;  %197 = vset.pattern.permute.xlu0 %v225_v1  ;;  %198 = vset.pattern.permute.xlu1 %v226_v2 }
   0x2   :  { %8 = vsyncpa [#allocation3], 0  ;;  %21 = vperm.xlu0 %197, %v17_v0   ;;  %76 = vperm.xlu1 %198, %v17_v0   ;;  %v18_v3 = vld [vmem:[%s275_s2] sm:$0xff]  ;;  %v227_v4 = vmov 2   ;;  %v26_v5 = vlaneseq  ;;  %v16_v12 = vld [vmem:[%s273_s0 + $0x8] sm:$0x77] }
   0x3   :  { %v15_v11 = vld [vmem:[%s273_s0] sm:$0x77]  ;;  %s228_s0 = smov [#allocation2]  }
   0x4   :  { %v27_v6 = vshrl.u32 %v26_v5, 7  ;;  %s185_s2 = sshll.u32 %s228_s0, 4  ;;  %s186_s2 = int_to_ptr.vmem [resolvable:$true] %s185_s2 }
   0x5   :  { %s201_s19 = scalar_lea.vmem %s186_s2, 512  ;;  %p206_p1 = scmp.lt.s32.totalorder %s186_s2, %s186_s2 }
   0x6   :  { %68 = vperm.xlu0 %197, %v18_v3   ;;  %199 = vset.pattern.permute.xlu1 %v227_v4  ;;  %v28_v7 = vsub.s32 0, %v27_v6  ;;  %v32_v8 = vsub.s32 4, %v27_v6  ;;  %v81_v9 = vsub.s32 1, %v27_v6  ;;  %v85_v10 = vsub.s32 5, %v27_v6  ;;  %p202_p0 = scmp.ne.s32.totalorder %s186_s2, %s201_s19  ;;  %p207_p2 = scmp.lt.s32.totalorder %s201_s19, %s201_s19 }
   0x7   :  { %124 = vperm.xlu1 %199, %v17_v0   ;;  %v129_v13 = vsub.s32 2, %v27_v6  ;;  %v133_v14 = vsub.s32 6, %v27_v6 }
   0x8   :  { %v29_v15 = vrot.slane %v15_v11, %v28_v7  ;;  %v33_v16 = vrot.slane %v15_v11, %v32_v8  ;;  %v37_v17 = vrot.slane %v16_v12, %v28_v7  ;;  %v41_v18 = vrot.slane %v16_v12, %v32_v8  ;;  %p208_p3 = por %p207_p2, %p206_p1 }
   0x9   :  { %v82_v19 = vrot.slane %v15_v11, %v81_v9  ;;  %v86_v20 = vrot.slane %v15_v11, %v85_v10  ;;  %v90_v21 = vrot.slane %v16_v12, %v81_v9  ;;  %v94_v22 = vrot.slane %v16_v12, %v85_v10 }
   0xa   :  { %200 = vset.pattern.permute.xlu0 %v227_v4  ;;  %v130_v23 = vrot.slane %v15_v11, %v129_v13  ;;  %v134_v24 = vrot.slane %v15_v11, %v133_v14  ;;  %v138_v25 = vrot.slane %v16_v12, %v129_v13  ;;  %v142_v26 = vrot.slane %v16_v12, %v133_v14  ;;  %p209_p4 = pnand %p208_p3, %p202_p0 }
   0xb   :  { %v49_v27 = vrot.slane %v29_v15, %v28_v7  ;;  %v53_v28 = vrot.slane %v33_v16, %v28_v7  ;;  %v57_v29 = vrot.slane %v37_v17, %v28_v7  ;;  %v61_v30 = vrot.slane %v41_v18, %v28_v7 }
   0xc   :  { %v102_v33 = vrot.slane %v82_v19, %v81_v9  ;;  %v106_v34 = vrot.slane %v86_v20, %v81_v9  ;;  %v110_v35 = vrot.slane %v90_v21, %v81_v9  ;;  %v114_v36 = vrot.slane %v94_v22, %v81_v9 }
   0xd   :  { %v150_v37 = vrot.slane %v130_v23, %v129_v13  ;;  %v154_v38 = vrot.slane %v134_v24, %v129_v13  ;;  %v158_v39 = vrot.slane %v138_v25, %v129_v13  ;;  %v162_v40 = vrot.slane %v142_v26, %v129_v13 }
  0x81   :  { %v22_v31 = vpop.permute.xlu0 %21  ;;  %v77_v32 = vpop.permute.xlu1 %76 }
  0x82   :  { %v62_v41 = vmul.f32 %v49_v27, %v22_v31  ;;  %v63_v42 = vmul.f32 %v53_v28, %v22_v31  ;;  %v64_v43 = vmul.f32 %v57_v29, %v22_v31  ;;  %v65_v44 = vmul.f32 %v61_v30, %v22_v31 }
  0x83   :  { %v115_v45 = vmul.f32 %v102_v33, %v77_v32  ;;  %v116_v46 = vmul.f32 %v106_v34, %v77_v32  ;;  %v117_v47 = vmul.f32 %v110_v35, %v77_v32  ;;  %v118_v48 = vmul.f32 %v114_v36, %v77_v32 }
  0x85   :  { %v69_v49 = vpop.permute.xlu0 %68 }
  0x86   :  { %v71_v50 = vadd.f32 %v69_v49, %v62_v41  ;;  %v72_v51 = vadd.f32 %v69_v49, %v63_v42  ;;  %v73_v52 = vadd.f32 %v69_v49, %v64_v43  ;;  %v74_v53 = vadd.f32 %v69_v49, %v65_v44  ;;  %v125_v54 = vpop.permute.xlu1 %124 }
  0x87   :  { %v163_v55 = vmul.f32 %v150_v37, %v125_v54  ;;  %v164_v56 = vmul.f32 %v154_v38, %v125_v54  ;;  %v165_v57 = vmul.f32 %v158_v39, %v125_v54  ;;  %v166_v58 = vmul.f32 %v162_v40, %v125_v54 }
  0x88   :  { %v119_v59 = vadd.f32 %v115_v45, %v71_v50  ;;  %v120_v60 = vadd.f32 %v116_v46, %v72_v51  ;;  %v121_v61 = vadd.f32 %v117_v47, %v73_v52  ;;  %v122_v62 = vadd.f32 %v118_v48, %v74_v53 }
  0x8a   :  { %v167_v63 = vadd.f32 %v163_v55, %v119_v59  ;;  %v168_v0 = vadd.f32 %v164_v56, %v120_v60  ;;  %v169_v1 = vadd.f32 %v165_v57, %v121_v61  ;;  %v170_v2 = vadd.f32 %v166_v58, %v122_v62 }
  0x8c   :  { %v171_v3 = vmax.f32 %v167_v63, 0.0  ;;  %v172_v4 = vmax.f32 %v168_v0, 0.0  ;;  %v173_v5 = vmax.f32 %v169_v1, 0.0  ;;  %v174_v6 = vmax.f32 %v170_v2, 0.0 }
  0x8e   :  { %175 = vst [vmem:[#allocation2] sm:$0xff] %v171_v3  ;;  %176 = vst [vmem:[#allocation2 + $0x8] sm:$0xff] %v172_v4 }
  0x8f   :  { %177 = vst [vmem:[#allocation2 + $0x10] sm:$0xff] %v173_v5  ;;  %178 = vst [vmem:[#allocation2 + $0x18] sm:$0xff] %v174_v6 }
  0x90   :  { %212 = shalt.err (!%p209_p4)
}
  0x91   :  { %s213_s22 = scalar_lea.hbm %s276_s3, 512 }
  0x92   :  { %p214_p5 = scmp.ne.s32.totalorder %s276_s3, %s213_s22  ;;  %p217_p6 = scmp.lt.u32.totalorder %s213_s22, %s276_s3 }
  0x94   :  { %p219_p7 = pnand %p217_p6, %p214_p5 }
  0x96   :  { %222 = shalt.err (!%p219_p7)
}
  0x97   :  { %188 = dma.vmem_to_hbm [thread:$0]  %s186_s2, 512, %s276_s3, [#allocation3]  }
  0x98   :  { %223 = dma.done.wait [#allocation3], 512  }
  0x99   :  { %224 = vsyncadd [#allocation3], 4294966784 }
  0x9a   :  { %192 = vsyncpa [#allocation3], 1 }

</bundles_post_ra>
